<compile_context>
chip_gen: v7x
topology: tpu7x:2x2x1
jax: 0.10.0
libtpu: 0.0.40
codegen_flags: <defaults>
</compile_context>

<pallas_src>
import functools

import jax
import jax.numpy as jnp
from jax import lax
from jax.experimental import pallas as pl
from jax.experimental.pallas import tpu as pltpu

_MAX_COLS = 16384
_SMALL_INPUT_BYTES = 4 * 1024 * 1024


def _cdiv(a, b):
    return -(-a // b)


def _vmem_capacity_bytes():
    try:
        info = pltpu.get_tpu_info()
        cap = getattr(info, "vmem_capacity_bytes", None)
        if cap:
            return int(cap)
    except Exception:
        pass
    return 128 * 1024 * 1024  # conservative default (v5e / v6e class)


def _pick_k(bt, nd):
    """Pick k (a divisor of B*T) so cols = k*N*D is lane-friendly."""

    def score(k):
        cols = k * nd
        rows = bt // k
        return (
            0 if rows >= 8 else 1,        # sublane-complete row blocks first
            0 if cols % 128 == 0 else 1,  # lane-aligned cols
            0 if cols >= 512 else 1,      # wide enough to amortize per-row cost
            abs(cols - 1024),             # prefer ~1K lanes
        )

    best, best_score = 1, score(1)
    k = 2
    while k <= bt and k * nd <= _MAX_COLS:
        if bt % k == 0:
            s = score(k)
            if s < best_score:
                best, best_score = k, s
        k += 1
    return best


def _masked_mae_kernel(x_ref, t_ref, m_ref, out_ref, acc_ref, *,
                       tail_valid, maybe_ragged, inv_total):
    j = pl.program_id(0)
    nb = pl.num_programs(0)

    @pl.when(j == 0)
    def _():
        acc_ref[...] = jnp.zeros_like(acc_ref)

    x = x_ref[...].astype(jnp.float32)            # (TB, cols)
    t = t_ref[...].astype(jnp.float32)            # (TB, cols)
    d = x - t
    tb, cols = d.shape

    if maybe_ragged:
        # Only the last block can be ragged; zero out-of-range rows.  Use a
        # select (not a multiply) so OOB garbage / NaNs cannot leak through.
        row_id = lax.broadcasted_iota(jnp.int32, (tb, cols), 0)
        limit = jnp.where(j == nb - 1, tail_valid, tb)
        d = jnp.where(row_id < limit, d, 0.0)

    # Fold into sublane groups, apply the resident (8, cols) mask slab, and
    # accumulate lane-parallel partial sums (pure VPU adds, no cross-lane work).
    g = d.reshape(tb // 8, 8, cols)
    acc_ref[...] += jnp.abs(g * m_ref[...]).sum(axis=0)

    @pl.when(j == nb - 1)
    def _():
        total = jnp.sum(acc_ref[...]) * inv_total   # single cross-lane reduce
        out_ref[...] = jnp.broadcast_to(total, out_ref.shape)


def _masked_mae_dense(inputs, target, mask):
    m = mask.astype(jnp.float32)[None, None, :, None]
    x = inputs.astype(jnp.float32)
    t = target.astype(jnp.float32)
    return jnp.mean(jnp.abs(x * m - t * m))


def _masked_mae_pallas(inputs, target, mask):
    B, T, N, D = inputs.shape
    bt, nd = B * T, N * D
    total = bt * nd
    itemsize = jnp.dtype(inputs.dtype).itemsize

    # Lane-dense layout: fold k ND-slabs per row so rows*cols == total exactly
    # (pure reshape -> no jnp.pad, no extra HBM read/write pass).
    k = _pick_k(bt, nd)
    cols = k * nd
    rows = bt // k

    # Per-generation block sizing from physical VMEM capacity.
    vmem_cap = _vmem_capacity_bytes()
    block_target = (8 << 20) if vmem_cap <= (64 << 20) else (4 << 20)
    tb_target = max(8, (block_target // (itemsize * cols)) // 8 * 8)
    tb = min(tb_target, (rows // 8) * 8)          # multiple of 8, <= rows
    nb = _cdiv(rows, tb)
    tail_valid = rows - (nb - 1) * tb             # valid rows in last block
    maybe_ragged = (rows % tb) != 0

    x2 = inputs.reshape(rows, cols)
    t2 = target.reshape(rows, cols)

    # Resident mask slab (fetched once): (N,) -> (N, D) -> flat, tiled k times,
    # replicated to 8 sublanes so the in-kernel multiply needs no broadcast.
    m_row = jnp.broadcast_to(
        mask.astype(jnp.float32).reshape(N, 1), (N, D)).reshape(1, nd)
    m_slab = jnp.broadcast_to(jnp.tile(m_row, (1, k)), (8, cols))

    # VMEM budget: 2 inputs x 2 pipeline buffers + mask + accumulator + output.
    needed = (2 * 2 * tb * cols * itemsize + 2 * 8 * cols * 4
              + 8 * cols * 4 + 2 * 8 * 128 * 4)
    vmem_limit = int(min(max(needed + (4 << 20), 32 << 20), 0.75 * vmem_cap))

    kernel = functools.partial(
        _masked_mae_kernel,
        tail_valid=tail_valid,
        maybe_ragged=maybe_ragged,
        inv_total=1.0 / total,
    )

    out = pl.pallas_call(
        kernel,
        out_shape=jax.ShapeDtypeStruct((8, 128), jnp.float32),
        grid_spec=pltpu.PrefetchScalarGridSpec(
            num_scalar_prefetch=0,
            grid=(nb,),
            in_specs=[
                pl.BlockSpec((tb, cols), lambda j: (j, 0)),   # input rows
                pl.BlockSpec((tb, cols), lambda j: (j, 0)),   # target rows
                pl.BlockSpec((8, cols), lambda j: (0, 0)),    # resident mask
            ],
            out_specs=pl.BlockSpec((8, 128), lambda j: (0, 0)),
            scratch_shapes=[pltpu.VMEM((8, cols), jnp.float32)],
        ),
        compiler_params=pltpu.CompilerParams(
            dimension_semantics=("arbitrary",),   # single reduction axis
            vmem_limit_bytes=vmem_limit,
        ),
    )(x2, t2, m_slab)

    # TODO(synk): on v7x (2 TensorCores) a leading CORE_PARALLEL grid axis could
    # stream half the rows per core; omitted pending a profile (shared HBM BW).
    return out[0, 0]


def masked_mae_loss(inputs, target, mask, auxiliary_loss_weight=0.0, *,
                    force_pallas=False):
    """Pallas equivalent of MaskedMAELoss.forward.

    `inputs` may be an array or a tuple (prediction, auxiliary_loss),
    mirroring the PyTorch module (non-tuple input => no auxiliary term).
    """
    auxiliary_loss = None
    if isinstance(inputs, tuple):
        inputs, auxiliary_loss = inputs

    B, T, N, D = inputs.shape
    total_bytes = B * T * N * D * jnp.dtype(inputs.dtype).itemsize

    if (B * T) < 8 or (total_bytes < _SMALL_INPUT_BYTES and not force_pallas):
        # Degenerate / tiny shapes: a fused XLA reduction beats the fixed
        # pallas_call overhead; semantics identical.
        loss = _masked_mae_dense(inputs, target, mask)
    else:
        loss = _masked_mae_pallas(inputs, target, mask)

    if auxiliary_loss is None:
        return loss
    return loss + auxiliary_loss_weight * auxiliary_loss


def _reference(inputs, target, mask, auxiliary_loss_weight=0.0):
    auxiliary_loss = None
    if isinstance(inputs, tuple):
        inputs, auxiliary_loss = inputs
    m = mask[None, None, :, None].astype(jnp.float32)
    loss = jnp.mean(jnp.abs(inputs * m - target * m))
    if auxiliary_loss is None:
        return loss
    return loss + auxiliary_loss_weight * auxiliary_loss


if __name__ == "__main__":
    key = jax.random.PRNGKey(0)
    k1, k2, k3, k4 = jax.random.split(key, 4)

    # Small shape consistent with the module: (B, T, N, D)
    B, T, N, D = 2, 8, 16, 4
    x = jax.random.normal(k1, (B, T, N, D), dtype=jnp.float32)
    y = jax.random.normal(k2, (B, T, N, D), dtype=jnp.float32)
    mask = (jax.random.uniform(k3, (N,)) > 0.3).astype(jnp.float32)
    aux = jax.random.normal(k4, ())  # auxiliary loss scalar (tuple-input path)

    # 1) Plain-input path (single row-block, lane-aligned cols).
    loss = jax.block_until_ready(masked_mae_loss(x, y, mask, force_pallas=True))
    ref = _reference(x, y, mask)
    assert jnp.allclose(loss, ref, atol=1e-5, rtol=1e-5), (loss, ref)

    # 2) Tuple-input path with auxiliary loss weight.
    w = 0.5
    loss2 = jax.block_until_ready(
        masked_mae_loss((x, aux), y, mask, w, force_pallas=True))
    ref2 = _reference((x, aux), y, mask, w)
    assert jnp.allclose(loss2, ref2, atol=1e-5, rtol=1e-5), (loss2, ref2)

    # 3) Non-divisible shape: multi-block grid + ragged tail + unaligned cols.
    B2, T2, N2, D2 = 3, 13, 37, 5
    xb = jax.random.normal(k1, (B2, T2, N2, D2), dtype=jnp.float32)
    yb = jax.random.normal(k2, (B2, T2, N2, D2), dtype=jnp.float32)
    mb = (jax.random.uniform(k3, (N2,)) > 0.5).astype(jnp.float32)
    loss3 = jax.block_until_ready(masked_mae_loss(xb, yb, mb, force_pallas=True))
    ref3 = _reference(xb, yb, mb)
    assert jnp.allclose(loss3, ref3, atol=1e-5, rtol=1e-5), (loss3, ref3)

    print("KERNEL_OK")
</pallas_src>

<mosaic_0001>
module attributes {stable_mosaic.version = 11 : i64} {
  func.func @_masked_mae_kernel(%arg0: i32, %arg1: memref<8x128xf32, #tpu.memory_space<vmem>>, %arg2: memref<8x128xf32, #tpu.memory_space<vmem>>, %arg3: memref<8x128xf32, #tpu.memory_space<vmem>>, %arg4: memref<8x128xf32, #tpu.memory_space<vmem>>, %arg5: memref<8x128xf32, #tpu.memory_space<vmem>>) attributes {dimension_semantics = [#tpu.dimension_semantics<arbitrary>], iteration_bounds = array<i64: 1>, scalar_prefetch = 0 : i64, scratch_operands = 1 : i64, tpu.core_type = #tpu.core_type<tc>, window_params = [{transform_indices = @transform_0, window_bounds = array<i64: 8, 128>}, {transform_indices = @transform_1, window_bounds = array<i64: 8, 128>}, {pipeline_mode = #tpu.pipeline_mode<synchronous>, transform_indices = @transform_2, window_bounds = array<i64: 8, 128>}, {pipeline_mode = #tpu.pipeline_mode<synchronous>, transform_indices = @transform_3, window_bounds = array<i64: 8, 128>}]} {
    %c0_i32 = arith.constant 0 : i32
    %0 = arith.cmpi eq, %arg0, %c0_i32 : i32
    %1 = arith.extui %0 : i1 to i32
    %c0_i32_0 = arith.constant 0 : i32
    %2 = arith.cmpi ne, %1, %c0_i32_0 : i32
    scf.if %2 {
      %cst_12 = arith.constant 0.000000e+00 : f32
      %18 = vector.broadcast %cst_12 : f32 to vector<8x128xf32>
      %c0_13 = arith.constant 0 : index
      %c0_14 = arith.constant 0 : index
      %19 = vector.load %arg5[%c0_13, %c0_14] : memref<8x128xf32, #tpu.memory_space<vmem>>, vector<8x128xf32>
      tpu.vector_store %arg5[%c0_13, %c0_14], %18 {strides = array<i32>} : memref<8x128xf32, #tpu.memory_space<vmem>>, vector<8x128xf32>,
    } else {
    }
    %c0 = arith.constant 0 : index
    %c0_1 = arith.constant 0 : index
    %3 = vector.load %arg1[%c0, %c0_1] : memref<8x128xf32, #tpu.memory_space<vmem>>, vector<8x128xf32>
    %c0_2 = arith.constant 0 : index
    %c0_3 = arith.constant 0 : index
    %4 = vector.load %arg2[%c0_2, %c0_3] : memref<8x128xf32, #tpu.memory_space<vmem>>, vector<8x128xf32>
    %5 = arith.subf %3, %4 : vector<8x128xf32>
    %6 = vector.shape_cast %5 : vector<8x128xf32> to vector<1x8x128xf32>
    %c0_4 = arith.constant 0 : index
    %c0_5 = arith.constant 0 : index
    %7 = vector.load %arg5[%c0_4, %c0_5] : memref<8x128xf32, #tpu.memory_space<vmem>>, vector<8x128xf32>
    %c0_6 = arith.constant 0 : index
    %c0_7 = arith.constant 0 : index
    %8 = vector.load %arg3[%c0_6, %c0_7] : memref<8x128xf32, #tpu.memory_space<vmem>>, vector<8x128xf32>
    %9 = vector.shape_cast %8 : vector<8x128xf32> to vector<1x8x128xf32>
    %10 = arith.mulf %6, %9 : vector<1x8x128xf32>
    %11 = math.absf %10 : vector<1x8x128xf32>
    %cst = arith.constant dense<0.000000e+00> : vector<8x128xf32>
    %12 = vector.multi_reduction <add>, %11, %cst [0] : vector<1x8x128xf32> to vector<8x128xf32>
    %13 = arith.addf %7, %12 : vector<8x128xf32>
    %c0_8 = arith.constant 0 : index
    %c0_9 = arith.constant 0 : index
    %14 = vector.load %arg5[%c0_8, %c0_9] : memref<8x128xf32, #tpu.memory_space<vmem>>, vector<8x128xf32>
    tpu.vector_store %arg5[%c0_8, %c0_9], %13 {strides = array<i32>} : memref<8x128xf32, #tpu.memory_space<vmem>>, vector<8x128xf32>,
    %c0_i32_10 = arith.constant 0 : i32
    %15 = arith.cmpi eq, %arg0, %c0_i32_10 : i32
    %16 = arith.extui %15 : i1 to i32
    %c0_i32_11 = arith.constant 0 : i32
    %17 = arith.cmpi ne, %16, %c0_i32_11 : i32
    scf.if %17 {
      %c0_12 = arith.constant 0 : index
      %c0_13 = arith.constant 0 : index
      %18 = vector.load %arg5[%c0_12, %c0_13] : memref<8x128xf32, #tpu.memory_space<vmem>>, vector<8x128xf32>
      %19 = vector.shape_cast %18 : vector<8x128xf32> to vector<1x8x128xf32>
      %cst_14 = arith.constant dense<0.000000e+00> : vector<1xf32>
      %20 = vector.multi_reduction <add>, %19, %cst_14 [1, 2] : vector<1x8x128xf32> to vector<1xf32>
      %21 = vector.shape_cast %20 : vector<1xf32> to vector<1x1x1xf32>
      %22 = vector.extract %21[0, 0, 0] : f32 from vector<1x1x1xf32>
      %cst_15 = arith.constant 9.765625E-4 : f32
      %23 = arith.mulf %22, %cst_15 : f32
      %24 = vector.broadcast %23 : f32 to vector<8x128xf32>
      %c0_16 = arith.constant 0 : index
      %c0_17 = arith.constant 0 : index
      %25 = vector.load %arg4[%c0_16, %c0_17] : memref<8x128xf32, #tpu.memory_space<vmem>>, vector<8x128xf32>
      tpu.vector_store %arg4[%c0_16, %c0_17], %24 {strides = array<i32>} : memref<8x128xf32, #tpu.memory_space<vmem>>, vector<8x128xf32>,
    } else {
    }
    return
  }
  func.func @transform_0(%arg0: i32) -> (i32, i32) {
    %c0_i32 = arith.constant 0 : i32
    %c0_i32_0 = arith.constant 0 : i32
    return %arg0, %c0_i32 : i32, i32
  }
  func.func @transform_1(%arg0: i32) -> (i32, i32) {
    %c0_i32 = arith.constant 0 : i32
    %c0_i32_0 = arith.constant 0 : i32
    return %arg0, %c0_i32 : i32, i32
  }
  func.func @transform_2(%arg0: i32) -> (i32, i32) {
    %c0_i32 = arith.constant 0 : i32
    %c0_i32_0 = arith.constant 0 : i32
    %c0_i32_1 = arith.constant 0 : i32
    return %c0_i32, %c0_i32_0 : i32, i32
  }
  func.func @transform_3(%arg0: i32) -> (i32, i32) {
    %c0_i32 = arith.constant 0 : i32
    %c0_i32_0 = arith.constant 0 : i32
    %c0_i32_1 = arith.constant 0 : i32
    return %c0_i32, %c0_i32_0 : i32, i32
  }
}

</mosaic_0001>

<bundles_post_ra>
// kernel: tpu_custom_call.1
= control target key start
LH: loop header
LB: loop body
LE: loop exit
PB: predicated region body
PF: predicated region fallthrough
CT: control target
= control target key end

     0   :  { %8 = vsyncpa [#allocation4], 0  ;;  %s269_s0 = inlined_call_operand.hbm [shape: f32[8,128], index: 0, kind: input, shape index: {}]   ;;  %s270_s1 = inlined_call_operand.hbm [shape: f32[8,128], index: 1, kind: input, shape index: {}]   ;;  %s271_s2 = inlined_call_operand.hbm [shape: f32[8,128], index: 2, kind: input, shape index: {}]   ;;  %s272_s3 = inlined_call_operand.hbm [shape: f32[8,128], index: 3, kind: output, shape index: {}]  }
   0x1   :  { %9 = vsyncpa [#allocation7], 0 }
   0x2   :  { %10 = vsyncpa [#allocation5], 0  ;;  %s197_s12 = smov [#allocation6]   ;;  %s198_s14 = smov [#allocation3]  }
   0x3   :  { %s27_s13 = sshll.u32 %s197_s12, 4  ;;  %s17_s15 = sshll.u32 %s198_s14, 4  ;;  %s28_s13 = int_to_ptr.vmem [resolvable:$true] %s27_s13  ;;  %s18_s15 = int_to_ptr.vmem [resolvable:$true] %s17_s15 }
   0x4   :  { %s103_s18 = scalar_lea.hbm %s270_s1, 128 }
   0x5   :  { %p104_p0 = scmp.ne.s32.totalorder %s270_s1, %s103_s18  ;;  %p107_p1 = scmp.lt.u32.totalorder %s103_s18, %s270_s1 }
   0x7   :  { %p109_p2 = pnand %p107_p1, %p104_p0 }
   0x9   :  { %112 = shalt.err (!%p109_p2)
}
   0xa   :  { %s113_s23 = scalar_lea.vmem %s28_s13, 128  ;;  %p118_p4 = scmp.lt.s32.totalorder %s28_s13, %s28_s13 }
   0xb   :  { %p114_p3 = scmp.ne.s32.totalorder %s28_s13, %s113_s23  ;;  %p119_p5 = scmp.lt.s32.totalorder %s113_s23, %s113_s23 }
   0xd   :  { %p120_p6 = por %p119_p5, %p118_p4 }
   0xf   :  { %p121_p7 = pnand %p120_p6, %p114_p3 }
  0x11   :  { %124 = shalt.err (!%p121_p7)
}
  0x12   :  { %30 = dma.hbm_to_vmem [thread:$0]  %s270_s1, 128, %s28_s13, [#allocation7]  }
  0x13   :  { %s125_s28 = scalar_lea.hbm %s269_s0, 128 }
  0x14   :  { %p126_p8 = scmp.ne.s32.totalorder %s269_s0, %s125_s28  ;;  %p129_p9 = scmp.lt.u32.totalorder %s125_s28, %s269_s0 }
  0x16   :  { %p131_p10 = pnand %p129_p9, %p126_p8 }
  0x18   :  { %134 = shalt.err (!%p131_p10)
}
  0x19   :  { %s135_s6 = scalar_lea.vmem %s18_s15, 128  ;;  %p140_p12 = scmp.lt.s32.totalorder %s18_s15, %s18_s15 }
  0x1a   :  { %p136_p11 = scmp.ne.s32.totalorder %s18_s15, %s135_s6  ;;  %p141_p13 = scmp.lt.s32.totalorder %s135_s6, %s135_s6 }
  0x1c   :  { %p142_p0 = por %p141_p13, %p140_p12 }
  0x1e   :  { %p143_p1 = pnand %p142_p0, %p136_p11 }
  0x20   :  { %146 = shalt.err (!%p143_p1)
}
  0x21   :  { %20 = dma.hbm_to_vmem [thread:$0]  %s269_s0, 128, %s18_s15, [#allocation4]  }
  0x22   :  { %s199_s8 = smov [#allocation8]   ;;  %s147_s12 = scalar_lea.hbm %s271_s2, 128 }
  0x23   :  { %s37_s9 = sshll.u32 %s199_s8, 4  ;;  %p148_p2 = scmp.ne.s32.totalorder %s271_s2, %s147_s12  ;;  %s38_s9 = int_to_ptr.vmem [resolvable:$true] %s37_s9 }
  0x24   :  { %p151_p3 = scmp.lt.u32.totalorder %s147_s12, %s271_s2 }
  0x26   :  { %p153_p4 = pnand %p151_p3, %p148_p2 }
  0x28   :  { %156 = shalt.err (!%p153_p4)
}
  0x29   :  { %s157_s18 = scalar_lea.vmem %s38_s9, 128  ;;  %p162_p6 = scmp.lt.s32.totalorder %s38_s9, %s38_s9 }
  0x2a   :  { %p158_p5 = scmp.ne.s32.totalorder %s38_s9, %s157_s18  ;;  %p163_p7 = scmp.lt.s32.totalorder %s157_s18, %s157_s18 }
  0x2c   :  { %p164_p8 = por %p163_p7, %p162_p6 }
  0x2e   :  { %p165_p9 = pnand %p164_p8, %p158_p5 }
  0x30   :  { %168 = shalt.err (!%p165_p9)
}
  0x31   :  { %40 = dma.hbm_to_vmem [thread:$0]  %s271_s2, 128, %s38_s9, [#allocation7]  }
  0x32   :  { %191 = dma.done.wait [#allocation4], 128  }
  0x33   :  { %192 = vsyncadd [#allocation4], 4294967168 }
  0x34   :  { %193 = dma.done.wait [#allocation7], 256  }
  0x35   :  { %194 = vsyncadd [#allocation7], 4294967040  ;;  %v55_v0 = vld [vmem:[#allocation3] sm:$0xff]  ;;  %v56_v1 = vld [vmem:[#allocation6] sm:$0xff]  ;;  %s200_s2 = smov [#allocation9]  }
  0x36   :  { %v59_v2 = vld [vmem:[#allocation8] sm:$0xff]  ;;  %v57_v3 = vsub.f32 %v55_v0, %v56_v1  ;;  %s87_s19 = sshll.u32 %s200_s2, 4  ;;  %s88_s19 = int_to_ptr.vmem [resolvable:$true] %s87_s19 }
  0x37   :  { %s169_s22 = scalar_lea.vmem %s88_s19, 128  ;;  %p174_p11 = scmp.lt.s32.totalorder %s88_s19, %s88_s19 }
  0x38   :  { %v60_v4 = vmul.f32 %v59_v2, %v57_v3  ;;  %p170_p10 = scmp.ne.s32.totalorder %s88_s19, %s169_s22  ;;  %p175_p12 = scmp.lt.s32.totalorder %s169_s22, %s169_s22 }
  0x3a   :  { %v61_v5 = vand.u32 2147483647, %v60_v4  ;;  %p176_p13 = por %p175_p12, %p174_p11 }
  0x3c   :  { %69 = vadd.xlane.f32.xlu0 %v61_v5  ;;  %p177_p0 = pnand %p176_p13, %p170_p10 }
  0xc9   :  { %v70_v6 = vpop.xlane.xlu0 %69 }
  0xca   :  { %v71_v7 = vrot.slane %v70_v6, 4 }
  0xcc   :  { %v72_v8 = vadd.f32 %v71_v7, %v70_v6 }
  0xce   :  { %v73_v9 = vrot.slane %v72_v8, 2 }
  0xd0   :  { %v74_v10 = vadd.f32 %v73_v9, %v72_v8 }
  0xd2   :  { %v75_v11 = vrot.slane %v74_v10, 1 }
  0xd4   :  { %v76_v12 = vadd.f32 %v75_v11, %v74_v10 }
  0xd6   :  { %97 = vpush %v76_v12 }
 0x107   :  { %s98_s20 = spop %97 }
 0x108   :  { %s78_s21 = smul.f32 0.0009765625, %s98_s20 }
 0x10a   :  { %v79_v13 = vstv %s78_s21 }
 0x10b   :  { %80 = vst [vmem:[#allocation9] sm:$0xff] %v79_v13 }
 0x10c   :  { %180 = shalt.err (!%p177_p0)
}
 0x10d   :  { %s181_s25 = scalar_lea.hbm %s272_s3, 128 }
 0x10e   :  { %p182_p1 = scmp.ne.s32.totalorder %s272_s3, %s181_s25  ;;  %p185_p2 = scmp.lt.u32.totalorder %s181_s25, %s272_s3 }
 0x110   :  { %p187_p3 = pnand %p185_p2, %p182_p1 }
 0x112   :  { %190 = shalt.err (!%p187_p3)
}
 0x113   :  { %90 = dma.vmem_to_hbm [thread:$0]  %s88_s19, 128, %s272_s3, [#allocation5]  }
 0x114   :  { %195 = dma.done.wait [#allocation5], 128  }
 0x115   :  { %196 = vsyncadd [#allocation5], 4294967168 }
 0x116   :  { %94 = vsyncpa [#allocation4], 1 }
 0x117   :  { %95 = vsyncpa [#allocation7], 1 }
 0x118   :  { %96 = vsyncpa [#allocation5], 1 }

</bundles_post_ra>
